<compile_context>
chip_gen: v5e
topology: v5e:2x2
jax: 0.10.0
libtpu: 0.0.40
codegen_flags: <defaults>
</compile_context>

<pallas_src>
import functools

import jax
import jax.numpy as jnp
from jax.experimental import pallas as pl
from jax.experimental.pallas import tpu as pltpu

D_IN = 3 * 32 * 32      # 3072
H1 = 32                 # fc1 out
H1_PAD = 128            # lane-padded fc1 out
H2 = 64                 # fc2 out
H2_PAD = 128            # lane-padded fc2 out
D_OUT = 10              # fc3 out
D_OUT_PAD = 128         # lane-padded fc3 out
DEFAULT_TILE_B = 1024   # bf16 x tile ~6.3 MiB (x2 buffers); fits all generations


def _round_up(n, m):
    return ((n + m - 1) // m) * m


def mlp2_kernel(x_ref, w1_ref, b1_ref, w2_ref, w3_ref, b3_ref, o_ref):
    # fc1: bf16 x bf16 on the MXU, f32 accumulation; + bias + ReLU.
    # Padded output columns are exactly 0 (zero w1/b1 padding).
    h1 = jnp.dot(x_ref[...], w1_ref[...], preferred_element_type=jnp.float32)
    h1 = jnp.maximum(h1 + b1_ref[...], 0.0)
    # fc2 (no bias) + ReLU. Padded w2 rows/cols are 0 -> no contribution.
    h2 = jnp.dot(h1, w2_ref[...], preferred_element_type=jnp.float32)
    h2 = jnp.maximum(h2, 0.0)
    # fc3 + bias, written as a lane-dense (tb, 128) block.
    out = jnp.dot(h2, w3_ref[...], preferred_element_type=jnp.float32)
    o_ref[...] = (out + b3_ref[...]).astype(o_ref.dtype)


def prepare_params(w1, b1, w2, w3, b3):
    """One-time zero-padding (+ bf16 cast of w1), hoisted out of the forward."""
    w1p = jnp.zeros((D_IN, H1_PAD), jnp.bfloat16).at[:, :H1].set(
        jnp.asarray(w1).astype(jnp.bfloat16))
    b1p = jnp.zeros((1, H1_PAD), jnp.float32).at[:, :H1].set(
        jnp.asarray(b1, jnp.float32).reshape(1, H1))
    w2p = jnp.zeros((H1_PAD, H2_PAD), jnp.float32).at[:H1, :H2].set(
        jnp.asarray(w2, jnp.float32))
    w3p = jnp.zeros((H2_PAD, D_OUT_PAD), jnp.float32).at[:H2, :D_OUT].set(
        jnp.asarray(w3, jnp.float32))
    b3p = jnp.zeros((1, D_OUT_PAD), jnp.float32).at[:, :D_OUT].set(
        jnp.asarray(b3, jnp.float32).reshape(1, D_OUT))
    return w1p, b1p, w2p, w3p, b3p


@functools.partial(jax.jit, static_argnames=("tile_b",))
def mlp2_forward(x, w1p, b1p, w2p, w3p, b3p, tile_b=DEFAULT_TILE_B):
    B = x.shape[0]
    # Feed fc1 in bf16 (no-op if the caller already supplies bf16 x; otherwise a
    # single convert). Accumulation stays f32 inside the kernel.
    x = x.astype(jnp.bfloat16)

    # Batch tile: multiple of 8 sublanes, capped at tile_b. Keep >= 2 grid
    # steps when there is enough work so both v7x TensorCores get a share.
    tb = min(tile_b, _round_up(B, 8))
    if B > 16 and pl.cdiv(B, tb) < 2:
        tb = _round_up(pl.cdiv(B, 2), 8)
    # Ragged last block instead of padding x: junk rows only ever flow row-wise
    # into output rows >= B, whose stores Pallas masks off.
    grid = (pl.cdiv(B, tb),)

    const = lambda i: (0, 0)  # weights/biases resident across grid steps
    resident = functools.partial(pl.BlockSpec, index_map=const,
                                 pipeline_mode=pl.Buffered(buffer_count=1))

    flops = 2 * B * (D_IN * H1_PAD + H1_PAD * H2_PAD + H2_PAD * D_OUT_PAD)
    bytes_accessed = (
        B * D_IN * 2                                   # bf16 x read
        + D_IN * H1_PAD * 2                            # bf16 w1
        + (H1_PAD + H1_PAD * H2_PAD + H2_PAD * D_OUT_PAD + D_OUT_PAD) * 4
        + B * D_OUT_PAD * 4                            # f32 output writeback
    )

    vmem_bytes = (
        2 * tb * D_IN * 2                              # double-buffered bf16 x tile
        + 2 * tb * D_OUT_PAD * 4                       # double-buffered f32 out tile
        + D_IN * H1_PAD * 2                            # w1 (single-buffered)
        + (H1_PAD + H1_PAD * H2_PAD + H2_PAD * D_OUT_PAD + D_OUT_PAD) * 4
    )
    vmem_limit = min(max(vmem_bytes + (8 << 20), 32 << 20), 56 << 20)

    out_padded = pl.pallas_call(
        mlp2_kernel,
        out_shape=jax.ShapeDtypeStruct((B, D_OUT_PAD), jnp.float32),
        grid=grid,
        in_specs=[
            pl.BlockSpec((tb, D_IN), lambda i: (i, 0)),     # x: tiled over batch
            resident((D_IN, H1_PAD)),                       # w1 (bf16, resident)
            resident((1, H1_PAD)),                          # b1
            resident((H1_PAD, H2_PAD)),                     # w2
            resident((H2_PAD, D_OUT_PAD)),                  # w3
            resident((1, D_OUT_PAD)),                       # b3
        ],
        out_specs=pl.BlockSpec((tb, D_OUT_PAD), lambda i: (i, 0)),
        compiler_params=pltpu.CompilerParams(
            dimension_semantics=("parallel",),
            vmem_limit_bytes=vmem_limit,
        ),
        cost_estimate=pl.CostEstimate(
            flops=flops, transcendentals=0, bytes_accessed=bytes_accessed
        ),
    )(x, w1p, b1p, w2p, w3p, b3p)

    # Slice back to the logical (B, 10) result (keep the 128-lane padding inside
    # the kernel so the store stays unmasked/lane-dense).
    return out_padded[:, :D_OUT]


def init_params(key):
    # Deterministic init mimicking nn.Linear's uniform(-1/sqrt(fan_in), 1/sqrt(fan_in)).
    k1, k2, k3, k4, k5 = jax.random.split(key, 5)

    def u(k, shape, fan_in):
        bound = float(fan_in) ** -0.5
        return jax.random.uniform(k, shape, jnp.float32, -bound, bound)

    w1 = u(k1, (D_IN, H1), D_IN)       # (in, out)
    b1 = u(k2, (1, H1), D_IN)
    w2 = u(k3, (H1, H2), H1)           # bias=False
    w3 = u(k4, (H2, D_OUT), H2)
    b3 = u(k5, (1, D_OUT), H2)
    return w1, b1, w2, w3, b3


def reference_forward(x, w1, b1, w2, w3, b3):
    h1 = jnp.maximum(x @ w1 + b1, 0.0)
    h2 = jnp.maximum(h1 @ w2, 0.0)
    return h2 @ w3 + b3


if __name__ == "__main__":
    key = jax.random.PRNGKey(0)
    kx, kp = jax.random.split(key)
    B = 8
    x = jax.random.normal(kx, (B, D_IN), jnp.float32)

    raw_params = init_params(kp)
    padded_params = prepare_params(*raw_params)   # one-time, outside forward

    out = mlp2_forward(x, *padded_params)
    out = jax.block_until_ready(out)

    ref = reference_forward(x, *raw_params)       # pure f32 reference
    assert out.shape == (B, D_OUT)
    # bf16 x/w1 feed (f32 accumulation) -> ~1e-3 level differences vs f32 ref.
    assert jnp.allclose(out, ref, atol=2e-2, rtol=2e-2)
    print("KERNEL_OK")
</pallas_src>

<mosaic_0001>
module attributes {stable_mosaic.version = 11 : i64} {
  func.func @mlp2_kernel(%arg0: i32, %arg1: memref<8x3072xbf16, #tpu.memory_space<vmem>>, %arg2: memref<3072x128xbf16, #tpu.memory_space<vmem>>, %arg3: memref<1x128xf32, #tpu.memory_space<vmem>>, %arg4: memref<128x128xf32, #tpu.memory_space<vmem>>, %arg5: memref<128x128xf32, #tpu.memory_space<vmem>>, %arg6: memref<1x128xf32, #tpu.memory_space<vmem>>, %arg7: memref<8x128xf32, #tpu.memory_space<vmem>>) attributes {dimension_semantics = [#tpu.dimension_semantics<parallel>], iteration_bounds = array<i64: 1>, scalar_prefetch = 0 : i64, scratch_operands = 0 : i64, tpu.core_type = #tpu.core_type<tc>, window_params = [{transform_indices = @transform_0, window_bounds = array<i64: 8, 3072>}, {pipeline_mode = #tpu.pipeline_mode<synchronous>, transform_indices = @transform_1, window_bounds = array<i64: 3072, 128>}, {pipeline_mode = #tpu.pipeline_mode<synchronous>, transform_indices = @transform_2, window_bounds = array<i64: 1, 128>}, {pipeline_mode = #tpu.pipeline_mode<synchronous>, transform_indices = @transform_3, window_bounds = array<i64: 128, 128>}, {pipeline_mode = #tpu.pipeline_mode<synchronous>, transform_indices = @transform_4, window_bounds = array<i64: 128, 128>}, {pipeline_mode = #tpu.pipeline_mode<synchronous>, transform_indices = @transform_5, window_bounds = array<i64: 1, 128>}, {transform_indices = @transform_6, window_bounds = array<i64: 8, 128>}]} {
    %c0 = arith.constant 0 : index
    %c0_0 = arith.constant 0 : index
    %0 = vector.load %arg1[%c0, %c0_0] : memref<8x3072xbf16, #tpu.memory_space<vmem>>, vector<8x3072xbf16>
    %c0_1 = arith.constant 0 : index
    %c0_2 = arith.constant 0 : index
    %1 = vector.load %arg2[%c0_1, %c0_2] : memref<3072x128xbf16, #tpu.memory_space<vmem>>, vector<3072x128xbf16>
    %cst = arith.constant dense<0.000000e+00> : vector<8x128xf32>
    %2 = tpu.matmul %0, %1, %cst {dimension_numbers = #tpu.dot_dimension_numbers<[1], [0], [0], [1], [0, 0, 1, 1], [], []>} : vector<8x3072xbf16>, vector<3072x128xbf16>, vector<8x128xf32> -> vector<8x128xf32>
    %c0_3 = arith.constant 0 : index
    %c0_4 = arith.constant 0 : index
    %3 = vector.load %arg3[%c0_3, %c0_4] : memref<1x128xf32, #tpu.memory_space<vmem>>, vector<1x128xf32>
    %4 = vector.broadcast %3 : vector<1x128xf32> to vector<8x128xf32>
    %5 = arith.addf %2, %4 : vector<8x128xf32>
    %cst_5 = arith.constant 0.000000e+00 : f32
    %6 = vector.broadcast %cst_5 : f32 to vector<8x128xf32>
    %7 = arith.maximumf %5, %6 : vector<8x128xf32>
    %c0_6 = arith.constant 0 : index
    %c0_7 = arith.constant 0 : index
    %8 = vector.load %arg4[%c0_6, %c0_7] : memref<128x128xf32, #tpu.memory_space<vmem>>, vector<128x128xf32>
    %cst_8 = arith.constant dense<0.000000e+00> : vector<8x128xf32>
    %9 = tpu.matmul %7, %8, %cst_8 {dimension_numbers = #tpu.dot_dimension_numbers<[1], [0], [0], [1], [0, 0, 1, 1], [], []>} : vector<8x128xf32>, vector<128x128xf32>, vector<8x128xf32> -> vector<8x128xf32>
    %cst_9 = arith.constant 0.000000e+00 : f32
    %10 = vector.broadcast %cst_9 : f32 to vector<8x128xf32>
    %11 = arith.maximumf %9, %10 : vector<8x128xf32>
    %c0_10 = arith.constant 0 : index
    %c0_11 = arith.constant 0 : index
    %12 = vector.load %arg5[%c0_10, %c0_11] : memref<128x128xf32, #tpu.memory_space<vmem>>, vector<128x128xf32>
    %cst_12 = arith.constant dense<0.000000e+00> : vector<8x128xf32>
    %13 = tpu.matmul %11, %12, %cst_12 {dimension_numbers = #tpu.dot_dimension_numbers<[1], [0], [0], [1], [0, 0, 1, 1], [], []>} : vector<8x128xf32>, vector<128x128xf32>, vector<8x128xf32> -> vector<8x128xf32>
    %c0_13 = arith.constant 0 : index
    %c0_14 = arith.constant 0 : index
    %14 = vector.load %arg6[%c0_13, %c0_14] : memref<1x128xf32, #tpu.memory_space<vmem>>, vector<1x128xf32>
    %15 = vector.broadcast %14 : vector<1x128xf32> to vector<8x128xf32>
    %16 = arith.addf %13, %15 : vector<8x128xf32>
    %c0_15 = arith.constant 0 : index
    %c0_16 = arith.constant 0 : index
    %17 = vector.load %arg7[%c0_15, %c0_16] : memref<8x128xf32, #tpu.memory_space<vmem>>, vector<8x128xf32>
    tpu.vector_store %arg7[%c0_15, %c0_16], %16 {strides = array<i32>} : memref<8x128xf32, #tpu.memory_space<vmem>>, vector<8x128xf32>,
    return
  }
  func.func @transform_0(%arg0: i32) -> (i32, i32) {
    %c0_i32 = arith.constant 0 : i32
    %c0_i32_0 = arith.constant 0 : i32
    return %arg0, %c0_i32 : i32, i32
  }
  func.func @transform_1(%arg0: i32) -> (i32, i32) {
    %c0_i32 = arith.constant 0 : i32
    %c0_i32_0 = arith.constant 0 : i32
    %c0_i32_1 = arith.constant 0 : i32
    return %c0_i32, %c0_i32_0 : i32, i32
  }
  func.func @transform_2(%arg0: i32) -> (i32, i32) {
    %c0_i32 = arith.constant 0 : i32
    %c0_i32_0 = arith.constant 0 : i32
    %c0_i32_1 = arith.constant 0 : i32
    return %c0_i32, %c0_i32_0 : i32, i32
  }
  func.func @transform_3(%arg0: i32) -> (i32, i32) {
    %c0_i32 = arith.constant 0 : i32
    %c0_i32_0 = arith.constant 0 : i32
    %c0_i32_1 = arith.constant 0 : i32
    return %c0_i32, %c0_i32_0 : i32, i32
  }
  func.func @transform_4(%arg0: i32) -> (i32, i32) {
    %c0_i32 = arith.constant 0 : i32
    %c0_i32_0 = arith.constant 0 : i32
    %c0_i32_1 = arith.constant 0 : i32
    return %c0_i32, %c0_i32_0 : i32, i32
  }
  func.func @transform_5(%arg0: i32) -> (i32, i32) {
    %c0_i32 = arith.constant 0 : i32
    %c0_i32_0 = arith.constant 0 : i32
    %c0_i32_1 = arith.constant 0 : i32
    return %c0_i32, %c0_i32_0 : i32, i32
  }
  func.func @transform_6(%arg0: i32) -> (i32, i32) {
    %c0_i32 = arith.constant 0 : i32
    %c0_i32_0 = arith.constant 0 : i32
    return %arg0, %c0_i32 : i32, i32
  }
}

</mosaic_0001>

<bundles_post_ra>
// kernel: mlp2_forward.1
= control target key start
LH: loop header
LB: loop body
LE: loop exit
PB: predicated region body
PF: predicated region fallthrough
CT: control target
= control target key end

     0   :  { %11 = vsyncpa [#allocation3], 0  ;;  %s3285_s0 = inlined_call_operand.vmem [shape: bf16[8,3072], index: 0, kind: input, shape index: {}]   ;;  %s3286_s1 = inlined_call_operand.hbm [shape: bf16[3072,128], index: 1, kind: input, shape index: {}]   ;;  %s3287_s2 = inlined_call_operand.vmem [shape: f32[1,128], index: 2, kind: input, shape index: {}]   ;;  %s3288_s3 = inlined_call_operand.vmem [shape: f32[128,128], index: 3, kind: input, shape index: {}]   ;;  %s3289_s4 = inlined_call_operand.vmem [shape: f32[128,128], index: 4, kind: input, shape index: {}]   ;;  %s3290_s5 = inlined_call_operand.vmem [shape: f32[1,128], index: 5, kind: input, shape index: {}]   ;;  %s3291_s6 = inlined_call_operand.hbm [shape: f32[8,128], index: 6, kind: output, shape index: {}]  }
   0x1   :  { %12 = vsyncpa [#allocation4], 0  ;;  %s19_s23 = sshll.u32 %s3286_s1, 4  ;;  %s3102_s24 = smov [#allocation2]   ;;  %s20_s23 = int_to_ptr.hbm [resolvable:$true] %s19_s23 }
   0x2   :  { %s21_s25 = sshll.u32 %s3102_s24, 4  ;;  %s3103_s26 = smov 64   ;;  %s22_s25 = int_to_ptr.vmem [resolvable:$true] %s21_s25 }
   0x3   :  { %s3104_s27 = smov 4  }
   0x4   :  { %27 = dma.hbm_to_vmem [thread:$0]  %s20_s23, 24576, %s22_s25, [#allocation3], %s3103_s26, %s3103_s26, %s3104_s27  }
   0x5   :  { %3098 = dma.done.wait [#allocation3], 24576  }
   0x6   :  { %3099 = vsyncadd [#allocation3], 4294942720  ;;  %v2859_v0 = vld [vmem:[#allocation2 + $0x38] sm:$0xff]  ;;  %v2858_v4 = vld [vmem:[#allocation2 + $0x30] sm:$0xff]  ;;  %s2074_s16 = sshll.u32 %s3291_s6, 4  ;;  %s2075_s16 = int_to_ptr.hbm [resolvable:$true] %s2074_s16 }
   0x7   :  { %v2867_v1 = vld [vmem:[#allocation2 + $0x78] sm:$0xff]  ;;  %1676 = vmatpush.bf16.msra.mxu0 %v2859_v0  ;;  %v2866_v5 = vld [vmem:[#allocation2 + $0x70] sm:$0xff]  ;;  %v2857_v8 = vld [vmem:[#allocation2 + $0x28] sm:$0xff] }
   0x8   :  { %v2875_v2 = vld [vmem:[#allocation2 + $0xb8] sm:$0xff]  ;;  %1689 = vmatpush.bf16.msra.mxu1 %v2867_v1  ;;  %v2874_v6 = vld [vmem:[#allocation2 + $0xb0] sm:$0xff]  ;;  %v2865_v9 = vld [vmem:[#allocation2 + $0x68] sm:$0xff] }
   0x9   :  { %v2883_v3 = vld [vmem:[#allocation2 + $0xf8] sm:$0xff]  ;;  %1702 = vmatpush.bf16.msra.mxu2 %v2875_v2  ;;  %v2882_v7 = vld [vmem:[#allocation2 + $0xf0] sm:$0xff]  ;;  %v2873_v10 = vld [vmem:[#allocation2 + $0xa8] sm:$0xff] }
   0xa   :  { %1715 = vmatpush.bf16.msra.mxu3 %v2883_v3  ;;  %v2881_v11 = vld [vmem:[#allocation2 + $0xe8] sm:$0xff]  ;;  %v2856_v12 = vld [vmem:[#allocation2 + $0x20] sm:$0xff]  ;;  %v2855_v16 = vld [vmem:[#allocation2 + $0x18] sm:$0xff] }
   0xb   :  { %1677 = vmatpush.bf16.msra.mxu0 %v2858_v4  ;;  %v2864_v13 = vld [vmem:[#allocation2 + $0x60] sm:$0xff]  ;;  %v2863_v17 = vld [vmem:[#allocation2 + $0x58] sm:$0xff]  ;;  %v2854_v20 = vld [vmem:[#allocation2 + $0x10] sm:$0xff] }
   0xc   :  { %1690 = vmatpush.bf16.msra.mxu1 %v2866_v5  ;;  %v2872_v14 = vld [vmem:[#allocation2 + $0xa0] sm:$0xff]  ;;  %v2871_v18 = vld [vmem:[#allocation2 + $0x98] sm:$0xff]  ;;  %v2862_v21 = vld [vmem:[#allocation2 + $0x50] sm:$0xff] }
   0xd   :  { %1703 = vmatpush.bf16.msra.mxu2 %v2874_v6  ;;  %v2880_v15 = vld [vmem:[#allocation2 + $0xe0] sm:$0xff]  ;;  %v2879_v19 = vld [vmem:[#allocation2 + $0xd8] sm:$0xff]  ;;  %v2870_v22 = vld [vmem:[#allocation2 + $0x90] sm:$0xff] }
   0xe   :  { %1716 = vmatpush.bf16.msra.mxu3 %v2882_v7  ;;  %v2878_v23 = vld [vmem:[#allocation2 + $0xd0] sm:$0xff]  ;;  %v2853_v24 = vld [vmem:[#allocation2 + $0x8] sm:$0xff]  ;;  %v40_v29 = vld [vmem:[%s3285_s0] sm:$0xff] }
   0xf   :  { %1678 = vmatpush.bf16.msra.mxu0 %v2857_v8  ;;  %v2861_v25 = vld [vmem:[#allocation2 + $0x48] sm:$0xff]  ;;  %v2852_v30 = vld [vmem:[#allocation2] sm:$0xff]  ;;  %v452_v33 = vunpack.c.l.b16 %v40_v29  ;;  %v453_v37 = vunpack.c.h.b16 %v40_v29  ;;  %v2891_v38 = vld [vmem:[#allocation2 + $0x138] sm:$0xff] }
  0x10   :  { %1691 = vmatpush.bf16.msra.mxu1 %v2865_v9  ;;  %v2869_v26 = vld [vmem:[#allocation2 + $0x88] sm:$0xff]  ;;  %v2860_v31 = vld [vmem:[#allocation2 + $0x40] sm:$0xff]  ;;  %v2899_v39 = vld [vmem:[#allocation2 + $0x178] sm:$0xff] }
  0x11   :  { %1704 = vmatpush.bf16.msra.mxu2 %v2873_v10  ;;  %v2877_v27 = vld [vmem:[#allocation2 + $0xc8] sm:$0xff]  ;;  %v2868_v34 = vld [vmem:[#allocation2 + $0x80] sm:$0xff]  ;;  %v2907_v40 = vld [vmem:[#allocation2 + $0x1b8] sm:$0xff]  ;;  %v476_v43 = vpack.c.b16 %v452_v33, %v452_v33  ;;  %v477_v45 = vpack.c.b16 %v453_v37, %v453_v37 }
  0x12   :  { %1717 = vmatpush.bf16.msra.mxu3 %v2881_v11  ;;  %v41_v28 = vld [vmem:[%s3285_s0 + $0x8] sm:$0xff]  ;;  %v2876_v35 = vld [vmem:[#allocation2 + $0xc0] sm:$0xff]  ;;  %v2915_v41 = vld [vmem:[#allocation2 + $0x1f8] sm:$0xff] }
  0x13   :  { %1679 = vmatpush.bf16.msra.mxu0 %v2856_v12  ;;  %v454_v32 = vunpack.c.l.b16 %v41_v28  ;;  %v455_v36 = vunpack.c.h.b16 %v41_v28  ;;  %v2890_v46 = vld [vmem:[#allocation2 + $0x130] sm:$0xff]  ;;  %v2889_v50 = vld [vmem:[#allocation2 + $0x128] sm:$0xff]  ;;  %v2888_v54 = vld [vmem:[#allocation2 + $0x120] sm:$0xff] }
  0x14   :  { %1692 = vmatpush.bf16.msra.mxu1 %v2864_v13  ;;  %v2898_v47 = vld [vmem:[#allocation2 + $0x170] sm:$0xff]  ;;  %v2897_v51 = vld [vmem:[#allocation2 + $0x168] sm:$0xff]  ;;  %v2896_v55 = vld [vmem:[#allocation2 + $0x160] sm:$0xff] }
  0x15   :  { %1705 = vmatpush.bf16.msra.mxu2 %v2872_v14  ;;  %v478_v42 = vpack.c.b16 %v454_v32, %v454_v32  ;;  %v479_v44 = vpack.c.b16 %v455_v36, %v455_v36  ;;  %v2906_v48 = vld [vmem:[#allocation2 + $0x1b0] sm:$0xff]  ;;  %v2905_v52 = vld [vmem:[#allocation2 + $0x1a8] sm:$0xff]  ;;  %v2904_v56 = vld [vmem:[#allocation2 + $0x1a0] sm:$0xff] }
  0x16   :  { %1718 = vmatpush.bf16.msra.mxu3 %v2880_v15  ;;  %v2914_v49 = vld [vmem:[#allocation2 + $0x1f0] sm:$0xff]  ;;  %v2913_v53 = vld [vmem:[#allocation2 + $0x1e8] sm:$0xff]  ;;  %v2912_v57 = vld [vmem:[#allocation2 + $0x1e0] sm:$0xff] }
  0x17   :  { %1680 = vmatpush.bf16.msra.mxu0 %v2855_v16  ;;  %v2887_v58 = vld [vmem:[#allocation2 + $0x118] sm:$0xff]  ;;  %v2886_v62 = vld [vmem:[#allocation2 + $0x110] sm:$0xff]  ;;  %v2885_v2 = vld [vmem:[#allocation2 + $0x108] sm:$0xff] }
  0x18   :  { %1693 = vmatpush.bf16.msra.mxu1 %v2863_v17  ;;  %v2895_v59 = vld [vmem:[#allocation2 + $0x158] sm:$0xff]  ;;  %v2894_v63 = vld [vmem:[#allocation2 + $0x150] sm:$0xff]  ;;  %v2893_v3 = vld [vmem:[#allocation2 + $0x148] sm:$0xff] }
  0x19   :  { %1706 = vmatpush.bf16.msra.mxu2 %v2871_v18  ;;  %v2903_v60 = vld [vmem:[#allocation2 + $0x198] sm:$0xff]  ;;  %v2902_v0 = vld [vmem:[#allocation2 + $0x190] sm:$0xff]  ;;  %v2901_v4 = vld [vmem:[#allocation2 + $0x188] sm:$0xff] }
  0x1a   :  { %1719 = vmatpush.bf16.msra.mxu3 %v2879_v19  ;;  %v2911_v61 = vld [vmem:[#allocation2 + $0x1d8] sm:$0xff]  ;;  %v2910_v1 = vld [vmem:[#allocation2 + $0x1d0] sm:$0xff]  ;;  %v2909_v5 = vld [vmem:[#allocation2 + $0x1c8] sm:$0xff] }
  0x1b   :  { %1681 = vmatpush.bf16.msra.mxu0 %v2854_v20  ;;  %v43_v6 = vld [vmem:[%s3285_s0 + $0x18] sm:$0xff]  ;;  %v42_v7 = vld [vmem:[%s3285_s0 + $0x10] sm:$0xff]  ;;  %v2884_v8 = vld [vmem:[#allocation2 + $0x100] sm:$0xff] }
  0x1c   :  { %1694 = vmatpush.bf16.msra.mxu1 %v2862_v21  ;;  %v2892_v9 = vld [vmem:[#allocation2 + $0x140] sm:$0xff]  ;;  %v458_v10 = vunpack.c.l.b16 %v43_v6  ;;  %v456_v11 = vunpack.c.l.b16 %v42_v7  ;;  %v459_v14 = vunpack.c.h.b16 %v43_v6  ;;  %v457_v15 = vunpack.c.h.b16 %v42_v7  ;;  %v2923_v16 = vld [vmem:[#allocation2 + $0x238] sm:$0xff]  ;;  %v2921_v28 = vld [vmem:[#allocation2 + $0x228] sm:$0xff] }
  0x1d   :  { %1707 = vmatpush.bf16.msra.mxu2 %v2870_v22  ;;  %v2900_v12 = vld [vmem:[#allocation2 + $0x180] sm:$0xff]  ;;  %v2931_v17 = vld [vmem:[#allocation2 + $0x278] sm:$0xff]  ;;  %v2929_v29 = vld [vmem:[#allocation2 + $0x268] sm:$0xff] }
  0x1e   :  { %1720 = vmatpush.bf16.msra.mxu3 %v2878_v23  ;;  %v2908_v13 = vld [vmem:[#allocation2 + $0x1c0] sm:$0xff]  ;;  %v2939_v18 = vld [vmem:[#allocation2 + $0x2b8] sm:$0xff]  ;;  %v482_v20 = vpack.c.b16 %v458_v10, %v458_v10  ;;  %v480_v21 = vpack.c.b16 %v456_v11, %v456_v11  ;;  %v483_v22 = vpack.c.b16 %v459_v14, %v459_v14  ;;  %v481_v23 = vpack.c.b16 %v457_v15, %v457_v15  ;;  %v2953_v6 = vld [vmem:[#allocation2 + $0x328] sm:$0xff] }
  0x1f   :  { %1682 = vmatpush.bf16.msra.mxu0 %v2853_v24  ;;  %v2947_v19 = vld [vmem:[#allocation2 + $0x2f8] sm:$0xff]  ;;  %v2922_v24 = vld [vmem:[#allocation2 + $0x230] sm:$0xff]  ;;  %v2920_v32 = vld [vmem:[#allocation2 + $0x220] sm:$0xff] }
  0x20   :  { %1695 = vmatpush.bf16.msra.mxu1 %v2861_v25  ;;  %v2930_v25 = vld [vmem:[#allocation2 + $0x270] sm:$0xff]  ;;  %v2928_v33 = vld [vmem:[#allocation2 + $0x260] sm:$0xff]  ;;  %v2919_v36 = vld [vmem:[#allocation2 + $0x218] sm:$0xff] }
  0x21   :  { %1708 = vmatpush.bf16.msra.mxu2 %v2869_v26  ;;  %v2938_v26 = vld [vmem:[#allocation2 + $0x2b0] sm:$0xff]  ;;  %v2927_v37 = vld [vmem:[#allocation2 + $0x258] sm:$0xff]  ;;  %v2961_v7 = vld [vmem:[#allocation2 + $0x368] sm:$0xff] }
  0x22   :  { %1721 = vmatpush.bf16.msra.mxu3 %v2877_v27  ;;  %v2946_v27 = vld [vmem:[#allocation2 + $0x2f0] sm:$0xff]  ;;  %v2952_v10 = vld [vmem:[#allocation2 + $0x320] sm:$0xff]  ;;  %v2951_v14 = vld [vmem:[#allocation2 + $0x318] sm:$0xff] }
  0x23   :  { %1683 = vmatpush.bf16.msra.mxu0 %v2852_v30  ;;  %v2937_v30 = vld [vmem:[#allocation2 + $0x2a8] sm:$0xff]  ;;  %v2960_v11 = vld [vmem:[#allocation2 + $0x360] sm:$0xff]  ;;  %v2959_v15 = vld [vmem:[#allocation2 + $0x358] sm:$0xff] }
  0x24   :  { %1696 = vmatpush.bf16.msra.mxu1 %v2860_v31  ;;  %v2945_v31 = vld [vmem:[#allocation2 + $0x2e8] sm:$0xff] }
  0x25   :  { %1709 = vmatpush.bf16.msra.mxu2 %v2868_v34  ;;  %v2936_v34 = vld [vmem:[#allocation2 + $0x2a0] sm:$0xff] }
  0x26   :  { %1722 = vmatpush.bf16.msra.mxu3 %v2876_v35  ;;  %1684 = vmatmul.bf16.vlgmr.msra.gmra.mxu0 %v476_v43  ;;  %v2944_v35 = vld [vmem:[#allocation2 + $0x2e0] sm:$0xff]  ;;  %v2942_v43 = vld [vmem:[#allocation2 + $0x2d0] sm:$0xff] }
  0x27   :  { %1728 = vmatpush.bf16.msrb.mxu0 %v2891_v38  ;;  %1697 = vmatmul.bf16.vlgmr.msra.gmra.mxu1 %v477_v45  ;;  %v2935_v38 = vld [vmem:[#allocation2 + $0x298] sm:$0xff]  ;;  %v2925_v45 = vld [vmem:[#allocation2 + $0x248] sm:$0xff] }
  0x28   :  { %1741 = vmatpush.bf16.msrb.mxu1 %v2899_v39  ;;  %1710 = vmatmul.bf16.vlgmr.msra.gmra.mxu2 %v478_v42  ;;  %v2943_v39 = vld [vmem:[#allocation2 + $0x2d8] sm:$0xff]  ;;  %v2934_v42 = vld [vmem:[#allocation2 + $0x290] sm:$0xff] }
  0x29   :  { %1754 = vmatpush.bf16.msrb.mxu2 %v2907_v40  ;;  %1723 = vmatmul.bf16.vlgmr.msra.gmra.mxu3 %v479_v44  ;;  %v2918_v40 = vld [vmem:[#allocation2 + $0x210] sm:$0xff]  ;;  %v2917_v44 = vld [vmem:[#allocation2 + $0x208] sm:$0xff] }
  0x2a   :  { %1767 = vmatpush.bf16.msrb.mxu3 %v2915_v41  ;;  %v2926_v41 = vld [vmem:[#allocation2 + $0x250] sm:$0xff] }
  0x2b   :  { %1729 = vmatpush.bf16.msrb.mxu0 %v2890_v46  ;;  %v2933_v46 = vld [vmem:[#allocation2 + $0x288] sm:$0xff] }
  0x2c   :  { %1742 = vmatpush.bf16.msrb.mxu1 %v2898_v47  ;;  %v2941_v47 = vld [vmem:[#allocation2 + $0x2c8] sm:$0xff] }
  0x2d   :  { %1755 = vmatpush.bf16.msrb.mxu2 %v2906_v48  ;;  %v44_v48 = vld [vmem:[%s3285_s0 + $0x20] sm:$0xff] }
  0x2e   :  { %1768 = vmatpush.bf16.msrb.mxu3 %v2914_v49  ;;  %v45_v49 = vld [vmem:[%s3285_s0 + $0x28] sm:$0xff] }
  0x2f   :  { %1730 = vmatpush.bf16.msrb.mxu0 %v2889_v50  ;;  %v2916_v50 = vld [vmem:[#allocation2 + $0x200] sm:$0xff] }
  0x30   :  { %1743 = vmatpush.bf16.msrb.mxu1 %v2897_v51  ;;  %v2924_v51 = vld [vmem:[#allocation2 + $0x240] sm:$0xff] }
  0x31   :  { %1756 = vmatpush.bf16.msrb.mxu2 %v2905_v52  ;;  %v460_v52 = vunpack.c.l.b16 %v44_v48 }
  0x32   :  { %1769 = vmatpush.bf16.msrb.mxu3 %v2913_v53  ;;  %v462_v53 = vunpack.c.l.b16 %v45_v49 }
  0x33   :  { %1731 = vmatpush.bf16.msrb.mxu0 %v2888_v54  ;;  %v2932_v54 = vld [vmem:[#allocation2 + $0x280] sm:$0xff] }
  0x34   :  { %1744 = vmatpush.bf16.msrb.mxu1 %v2896_v55  ;;  %v2940_v55 = vld [vmem:[#allocation2 + $0x2c0] sm:$0xff] }
  0x35   :  { %1757 = vmatpush.bf16.msrb.mxu2 %v2904_v56  ;;  %v461_v56 = vunpack.c.h.b16 %v44_v48  ;;  %v2985_v48 = vld [vmem:[#allocation2 + $0x428] sm:$0xff] }
  0x36   :  { %1770 = vmatpush.bf16.msrb.mxu3 %v2912_v57  ;;  %v463_v57 = vunpack.c.h.b16 %v45_v49  ;;  %v2993_v49 = vld [vmem:[#allocation2 + $0x468] sm:$0xff] }
  0x37   :  { %1732 = vmatpush.bf16.msrb.mxu0 %v2887_v58  ;;  %v2955_v58 = vld [vmem:[#allocation2 + $0x338] sm:$0xff] }
  0x38   :  { %1745 = vmatpush.bf16.msrb.mxu1 %v2895_v59  ;;  %v2963_v59 = vld [vmem:[#allocation2 + $0x378] sm:$0xff] }
  0x39   :  { %1758 = vmatpush.bf16.msrb.mxu2 %v2903_v60  ;;  %v2971_v60 = vld [vmem:[#allocation2 + $0x3b8] sm:$0xff] }
  0x3a   :  { %1771 = vmatpush.bf16.msrb.mxu3 %v2911_v61  ;;  %v2979_v61 = vld [vmem:[#allocation2 + $0x3f8] sm:$0xff] }
  0x3b   :  { %1733 = vmatpush.bf16.msrb.mxu0 %v2886_v62  ;;  %v484_v62 = vpack.c.b16 %v460_v52, %v460_v52  ;;  %v2984_v52 = vld [vmem:[#allocation2 + $0x420] sm:$0xff] }
  0x3c   :  { %1746 = vmatpush.bf16.msrb.mxu1 %v2894_v63  ;;  %v486_v63 = vpack.c.b16 %v462_v53, %v462_v53  ;;  %v2992_v53 = vld [vmem:[#allocation2 + $0x460] sm:$0xff] }
  0x3d   :  { %1759 = vmatpush.bf16.msrb.mxu2 %v2902_v0  ;;  %v485_v0 = vpack.c.b16 %v461_v56, %v461_v56  ;;  %v2983_v56 = vld [vmem:[#allocation2 + $0x418] sm:$0xff] }
  0x3e   :  { %1772 = vmatpush.bf16.msrb.mxu3 %v2910_v1  ;;  %v487_v1 = vpack.c.b16 %v463_v57, %v463_v57  ;;  %v2991_v57 = vld [vmem:[#allocation2 + $0x458] sm:$0xff] }
  0x3f   :  { %1734 = vmatpush.bf16.msrb.mxu0 %v2885_v2  ;;  %v2954_v2 = vld [vmem:[#allocation2 + $0x330] sm:$0xff] }
  0x40   :  { %1747 = vmatpush.bf16.msrb.mxu1 %v2893_v3  ;;  %v2962_v3 = vld [vmem:[#allocation2 + $0x370] sm:$0xff] }
  0x41   :  { %1760 = vmatpush.bf16.msrb.mxu2 %v2901_v4  ;;  %v2970_v4 = vld [vmem:[#allocation2 + $0x3b0] sm:$0xff] }
  0x42   :  { %1773 = vmatpush.bf16.msrb.mxu3 %v2909_v5  ;;  %v2978_v5 = vld [vmem:[#allocation2 + $0x3f0] sm:$0xff] }
  0x43   :  { %1735 = vmatpush.bf16.msrb.mxu0 %v2884_v8  ;;  %v2969_v8 = vld [vmem:[#allocation2 + $0x3a8] sm:$0xff] }
  0x44   :  { %1748 = vmatpush.bf16.msrb.mxu1 %v2892_v9  ;;  %v2977_v9 = vld [vmem:[#allocation2 + $0x3e8] sm:$0xff] }
  0x45   :  { %1761 = vmatpush.bf16.msrb.mxu2 %v2900_v12  ;;  %v2968_v12 = vld [vmem:[#allocation2 + $0x3a0] sm:$0xff] }
  0x46   :  { %1774 = vmatpush.bf16.msrb.mxu3 %v2908_v13  ;;  %1736 = vmatmul.bf16.vlgmr.msrb.gmra.mxu0 %v480_v21  ;;  %v2976_v13 = vld [vmem:[#allocation2 + $0x3e0] sm:$0xff]  ;;  %v2974_v21 = vld [vmem:[#allocation2 + $0x3d0] sm:$0xff] }
  0x47   :  { %1780 = vmatpush.bf16.msra.mxu0 %v2923_v16  ;;  %1749 = vmatmul.bf16.vlgmr.msrb.gmra.mxu1 %v481_v23  ;;  %v2967_v16 = vld [vmem:[#allocation2 + $0x398] sm:$0xff]  ;;  %v2957_v23 = vld [vmem:[#allocation2 + $0x348] sm:$0xff] }
  0x48   :  { %1793 = vmatpush.bf16.msra.mxu1 %v2931_v17  ;;  %1762 = vmatmul.bf16.vlgmr.msrb.gmra.mxu2 %v482_v20  ;;  %v2975_v17 = vld [vmem:[#allocation2 + $0x3d8] sm:$0xff]  ;;  %v2966_v20 = vld [vmem:[#allocation2 + $0x390] sm:$0xff] }
  0x49   :  { %1806 = vmatpush.bf16.msra.mxu2 %v2939_v18  ;;  %1775 = vmatmul.bf16.vlgmr.msrb.gmra.mxu3 %v483_v22  ;;  %v2950_v18 = vld [vmem:[#allocation2 + $0x310] sm:$0xff]  ;;  %v2949_v22 = vld [vmem:[#allocation2 + $0x308] sm:$0xff] }
  0x4a   :  { %1819 = vmatpush.bf16.msra.mxu3 %v2947_v19  ;;  %v2958_v19 = vld [vmem:[#allocation2 + $0x350] sm:$0xff] }
  0x4b   :  { %1781 = vmatpush.bf16.msra.mxu0 %v2922_v24  ;;  %v2965_v24 = vld [vmem:[#allocation2 + $0x388] sm:$0xff] }
  0x4c   :  { %1794 = vmatpush.bf16.msra.mxu1 %v2930_v25  ;;  %v2973_v25 = vld [vmem:[#allocation2 + $0x3c8] sm:$0xff] }
  0x4d   :  { %1807 = vmatpush.bf16.msra.mxu2 %v2938_v26  ;;  %v46_v26 = vld [vmem:[%s3285_s0 + $0x30] sm:$0xff] }
  0x4e   :  { %1820 = vmatpush.bf16.msra.mxu3 %v2946_v27  ;;  %v47_v27 = vld [vmem:[%s3285_s0 + $0x38] sm:$0xff] }
  0x4f   :  { %1782 = vmatpush.bf16.msra.mxu0 %v2921_v28  ;;  %v2948_v28 = vld [vmem:[#allocation2 + $0x300] sm:$0xff] }
  0x50   :  { %1795 = vmatpush.bf16.msra.mxu1 %v2929_v29  ;;  %v2956_v29 = vld [vmem:[#allocation2 + $0x340] sm:$0xff] }
  0x51   :  { %1808 = vmatpush.bf16.msra.mxu2 %v2937_v30  ;;  %v464_v30 = vunpack.c.l.b16 %v46_v26 }
  0x52   :  { %1821 = vmatpush.bf16.msra.mxu3 %v2945_v31  ;;  %v466_v31 = vunpack.c.l.b16 %v47_v27 }
  0x53   :  { %1783 = vmatpush.bf16.msra.mxu0 %v2920_v32  ;;  %v2964_v32 = vld [vmem:[#allocation2 + $0x380] sm:$0xff] }
  0x54   :  { %1796 = vmatpush.bf16.msra.mxu1 %v2928_v33  ;;  %v2972_v33 = vld [vmem:[#allocation2 + $0x3c0] sm:$0xff] }
  0x55   :  { %1809 = vmatpush.bf16.msra.mxu2 %v2936_v34  ;;  %v465_v34 = vunpack.c.h.b16 %v46_v26  ;;  %v3017_v26 = vld [vmem:[#allocation2 + $0x528] sm:$0xff] }
  0x56   :  { %1822 = vmatpush.bf16.msra.mxu3 %v2944_v35  ;;  %v467_v35 = vunpack.c.h.b16 %v47_v27  ;;  %v3025_v27 = vld [vmem:[#allocation2 + $0x568] sm:$0xff] }
  0x57   :  { %1784 = vmatpush.bf16.msra.mxu0 %v2919_v36  ;;  %v2987_v36 = vld [vmem:[#allocation2 + $0x438] sm:$0xff] }
  0x58   :  { %1797 = vmatpush.bf16.msra.mxu1 %v2927_v37  ;;  %v2995_v37 = vld [vmem:[#allocation2 + $0x478] sm:$0xff] }
  0x59   :  { %1810 = vmatpush.bf16.msra.mxu2 %v2935_v38  ;;  %v3003_v38 = vld [vmem:[#allocation2 + $0x4b8] sm:$0xff] }
  0x5a   :  { %1823 = vmatpush.bf16.msra.mxu3 %v2943_v39  ;;  %v3011_v39 = vld [vmem:[#allocation2 + $0x4f8] sm:$0xff] }
  0x5b   :  { %1785 = vmatpush.bf16.msra.mxu0 %v2918_v40  ;;  %v488_v40 = vpack.c.b16 %v464_v30, %v464_v30  ;;  %v3041_v30 = vld [vmem:[#allocation2 + $0x5e8] sm:$0xff] }
  0x5c   :  { %1798 = vmatpush.bf16.msra.mxu1 %v2926_v41  ;;  %v490_v41 = vpack.c.b16 %v466_v31, %v466_v31 }
  0x5d   :  { %1811 = vmatpush.bf16.msra.mxu2 %v2934_v42  ;;  %v489_v42 = vpack.c.b16 %v465_v34, %v465_v34 }
  0x5e   :  { %1824 = vmatpush.bf16.msra.mxu3 %v2942_v43  ;;  %v491_v43 = vpack.c.b16 %v467_v35, %v467_v35 }
  0x5f   :  { %1786 = vmatpush.bf16.msra.mxu0 %v2917_v44  ;;  %v2986_v44 = vld [vmem:[#allocation2 + $0x430] sm:$0xff] }
  0x60   :  { %1799 = vmatpush.bf16.msra.mxu1 %v2925_v45  ;;  %v2994_v45 = vld [vmem:[#allocation2 + $0x470] sm:$0xff] }
  0x61   :  { %1812 = vmatpush.bf16.msra.mxu2 %v2933_v46  ;;  %v3002_v46 = vld [vmem:[#allocation2 + $0x4b0] sm:$0xff] }
  0x62   :  { %1825 = vmatpush.bf16.msra.mxu3 %v2941_v47  ;;  %v3010_v47 = vld [vmem:[#allocation2 + $0x4f0] sm:$0xff] }
  0x63   :  { %1787 = vmatpush.bf16.msra.mxu0 %v2916_v50  ;;  %v3001_v50 = vld [vmem:[#allocation2 + $0x4a8] sm:$0xff] }
  0x64   :  { %1800 = vmatpush.bf16.msra.mxu1 %v2924_v51  ;;  %v3009_v51 = vld [vmem:[#allocation2 + $0x4e8] sm:$0xff] }
  0x65   :  { %1813 = vmatpush.bf16.msra.mxu2 %v2932_v54  ;;  %v3000_v54 = vld [vmem:[#allocation2 + $0x4a0] sm:$0xff] }
  0x66   :  { %1826 = vmatpush.bf16.msra.mxu3 %v2940_v55  ;;  %1788 = vmatmul.bf16.vlgmr.msra.gmra.mxu0 %v484_v62  ;;  %v3008_v55 = vld [vmem:[#allocation2 + $0x4e0] sm:$0xff]  ;;  %v2998_v62 = vld [vmem:[#allocation2 + $0x490] sm:$0xff] }
  0x67   :  { %1832 = vmatpush.bf16.msrb.mxu0 %v2955_v58  ;;  %1801 = vmatmul.bf16.vlgmr.msra.gmra.mxu1 %v485_v0  ;;  %v2999_v58 = vld [vmem:[#allocation2 + $0x498] sm:$0xff]  ;;  %v2981_v0 = vld [vmem:[#allocation2 + $0x408] sm:$0xff] }
  0x68   :  { %1845 = vmatpush.bf16.msrb.mxu1 %v2963_v59  ;;  %1814 = vmatmul.bf16.vlgmr.msra.gmra.mxu2 %v486_v63  ;;  %v3007_v59 = vld [vmem:[#allocation2 + $0x4d8] sm:$0xff]  ;;  %v3006_v63 = vld [vmem:[#allocation2 + $0x4d0] sm:$0xff] }
  0x69   :  { %1858 = vmatpush.bf16.msrb.mxu2 %v2971_v60  ;;  %1827 = vmatmul.bf16.vlgmr.msra.gmra.mxu3 %v487_v1  ;;  %v2982_v60 = vld [vmem:[#allocation2 + $0x410] sm:$0xff]  ;;  %v2989_v1 = vld [vmem:[#allocation2 + $0x448] sm:$0xff] }
  0x6a   :  { %1871 = vmatpush.bf16.msrb.mxu3 %v2979_v61  ;;  %v2990_v61 = vld [vmem:[#allocation2 + $0x450] sm:$0xff] }
  0x6b   :  { %1833 = vmatpush.bf16.msrb.mxu0 %v2954_v2  ;;  %v2997_v2 = vld [vmem:[#allocation2 + $0x488] sm:$0xff] }
  0x6c   :  { %1846 = vmatpush.bf16.msrb.mxu1 %v2962_v3  ;;  %v3005_v3 = vld [vmem:[#allocation2 + $0x4c8] sm:$0xff] }
  0x6d   :  { %1859 = vmatpush.bf16.msrb.mxu2 %v2970_v4  ;;  %v48_v4 = vld [vmem:[%s3285_s0 + $0x40] sm:$0xff] }
  0x6e   :  { %1872 = vmatpush.bf16.msrb.mxu3 %v2978_v5  ;;  %v49_v5 = vld [vmem:[%s3285_s0 + $0x48] sm:$0xff] }
  0x6f   :  { %1834 = vmatpush.bf16.msrb.mxu0 %v2953_v6  ;;  %v2980_v6 = vld [vmem:[#allocation2 + $0x400] sm:$0xff] }
  0x70   :  { %1847 = vmatpush.bf16.msrb.mxu1 %v2961_v7  ;;  %v2988_v7 = vld [vmem:[#allocation2 + $0x440] sm:$0xff] }
  0x71   :  { %1860 = vmatpush.bf16.msrb.mxu2 %v2969_v8  ;;  %v468_v8 = vunpack.c.l.b16 %v48_v4 }
  0x72   :  { %1873 = vmatpush.bf16.msrb.mxu3 %v2977_v9  ;;  %v470_v9 = vunpack.c.l.b16 %v49_v5 }
  0x73   :  { %1835 = vmatpush.bf16.msrb.mxu0 %v2952_v10  ;;  %v2996_v10 = vld [vmem:[#allocation2 + $0x480] sm:$0xff] }
  0x74   :  { %1848 = vmatpush.bf16.msrb.mxu1 %v2960_v11  ;;  %v3004_v11 = vld [vmem:[#allocation2 + $0x4c0] sm:$0xff] }
  0x75   :  { %1861 = vmatpush.bf16.msrb.mxu2 %v2968_v12  ;;  %v469_v12 = vunpack.c.h.b16 %v48_v4  ;;  %v3036_v4 = vld [vmem:[#allocation2 + $0x5c0] sm:$0xff] }
  0x76   :  { %1874 = vmatpush.bf16.msrb.mxu3 %v2976_v13  ;;  %v471_v13 = vunpack.c.h.b16 %v49_v5 }
  0x77   :  { %1836 = vmatpush.bf16.msrb.mxu0 %v2951_v14  ;;  %v3019_v14 = vld [vmem:[#allocation2 + $0x538] sm:$0xff] }
  0x78   :  { %1849 = vmatpush.bf16.msrb.mxu1 %v2959_v15  ;;  %v3027_v15 = vld [vmem:[#allocation2 + $0x578] sm:$0xff] }
  0x79   :  { %1862 = vmatpush.bf16.msrb.mxu2 %v2967_v16  ;;  %v3035_v16 = vld [vmem:[#allocation2 + $0x5b8] sm:$0xff] }
  0x7a   :  { %1875 = vmatpush.bf16.msrb.mxu3 %v2975_v17  ;;  %v3043_v17 = vld [vmem:[#allocation2 + $0x5f8] sm:$0xff] }
  0x7b   :  { %1837 = vmatpush.bf16.msrb.mxu0 %v2950_v18  ;;  %v492_v18 = vpack.c.b16 %v468_v8, %v468_v8 }
  0x7c   :  { %1850 = vmatpush.bf16.msrb.mxu1 %v2958_v19  ;;  %v494_v19 = vpack.c.b16 %v470_v9, %v470_v9 }
  0x7d   :  { %1863 = vmatpush.bf16.msrb.mxu2 %v2966_v20  ;;  %v493_v20 = vpack.c.b16 %v469_v12, %v469_v12 }
  0x7e   :  { %1876 = vmatpush.bf16.msrb.mxu3 %v2974_v21  ;;  %v495_v21 = vpack.c.b16 %v471_v13, %v471_v13 }
  0x7f   :  { %1838 = vmatpush.bf16.msrb.mxu0 %v2949_v22  ;;  %v3018_v22 = vld [vmem:[#allocation2 + $0x530] sm:$0xff] }
  0x80   :  { %1851 = vmatpush.bf16.msrb.mxu1 %v2957_v23  ;;  %v3026_v23 = vld [vmem:[#allocation2 + $0x570] sm:$0xff] }
  0x81   :  { %1864 = vmatpush.bf16.msrb.mxu2 %v2965_v24  ;;  %v3034_v24 = vld [vmem:[#allocation2 + $0x5b0] sm:$0xff] }
  0x82   :  { %1877 = vmatpush.bf16.msrb.mxu3 %v2973_v25  ;;  %v3042_v25 = vld [vmem:[#allocation2 + $0x5f0] sm:$0xff] }
  0x83   :  { %1839 = vmatpush.bf16.msrb.mxu0 %v2948_v28  ;;  %v3048_v28 = vld [vmem:[%s3287_s2] ss:$0 sm:$0xff] }
  0x84   :  { %1852 = vmatpush.bf16.msrb.mxu1 %v2956_v29  ;;  %v3033_v29 = vld [vmem:[#allocation2 + $0x5a8] sm:$0xff] }
  0x85   :  { %1865 = vmatpush.bf16.msrb.mxu2 %v2964_v32  ;;  %v3016_v32 = vld [vmem:[#allocation2 + $0x520] sm:$0xff] }
  0x86   :  { %1878 = vmatpush.bf16.msrb.mxu3 %v2972_v33  ;;  %1840 = vmatmul.bf16.vlgmr.msrb.gmra.mxu0 %v488_v40  ;;  %v3024_v33 = vld [vmem:[#allocation2 + $0x560] sm:$0xff]  ;;  %v3023_v40 = vld [vmem:[#allocation2 + $0x558] sm:$0xff] }
  0x87   :  { %1884 = vmatpush.bf16.msra.mxu0 %v2987_v36  ;;  %1853 = vmatmul.bf16.vlgmr.msrb.gmra.mxu1 %v489_v42  ;;  %v3032_v36 = vld [vmem:[#allocation2 + $0x5a0] sm:$0xff]  ;;  %v3039_v42 = vld [vmem:[#allocation2 + $0x5d8] sm:$0xff] }
  0x88   :  { %1897 = vmatpush.bf16.msra.mxu1 %v2995_v37  ;;  %1866 = vmatmul.bf16.vlgmr.msrb.gmra.mxu2 %v490_v41  ;;  %v3040_v37 = vld [vmem:[#allocation2 + $0x5e0] sm:$0xff]  ;;  %v3031_v41 = vld [vmem:[#allocation2 + $0x598] sm:$0xff] }
  0x89   :  { %1910 = vmatpush.bf16.msra.mxu2 %v3003_v38  ;;  %1879 = vmatmul.bf16.vlgmr.msrb.gmra.mxu3 %v491_v43 }
  0x8a   :  { %1923 = vmatpush.bf16.msra.mxu3 %v3011_v39  ;;  %v3015_v39 = vld [vmem:[#allocation2 + $0x518] sm:$0xff] }
  0x8b   :  { %1885 = vmatpush.bf16.msra.mxu0 %v2986_v44 }
  0x8c   :  { %1898 = vmatpush.bf16.msra.mxu1 %v2994_v45 }
  0x8d   :  { %1911 = vmatpush.bf16.msra.mxu2 %v3002_v46 }
  0x8e   :  { %1924 = vmatpush.bf16.msra.mxu3 %v3010_v47  ;;  %v3014_v47 = vld [vmem:[#allocation2 + $0x510] sm:$0xff] }
  0x8f   :  { %1886 = vmatpush.bf16.msra.mxu0 %v2985_v48  ;;  %v3022_v48 = vld [vmem:[#allocation2 + $0x550] sm:$0xff] }
  0x90   :  { %1899 = vmatpush.bf16.msra.mxu1 %v2993_v49 }
  0x91   :  { %1912 = vmatpush.bf16.msra.mxu2 %v3001_v50 }
  0x92   :  { %1925 = vmatpush.bf16.msra.mxu3 %v3009_v51  ;;  %v3030_v51 = vld [vmem:[#allocation2 + $0x590] sm:$0xff] }
  0x93   :  { %1887 = vmatpush.bf16.msra.mxu0 %v2984_v52  ;;  %v3038_v52 = vld [vmem:[#allocation2 + $0x5d0] sm:$0xff] }
  0x94   :  { %1900 = vmatpush.bf16.msra.mxu1 %v2992_v53  ;;  %v3013_v53 = vld [vmem:[#allocation2 + $0x508] sm:$0xff] }
  0x95   :  { %1913 = vmatpush.bf16.msra.mxu2 %v3000_v54  ;;  %v3021_v54 = vld [vmem:[#allocation2 + $0x548] sm:$0xff] }
  0x96   :  { %1926 = vmatpush.bf16.msra.mxu3 %v3008_v55  ;;  %v50_v55 = vld [vmem:[%s3285_s0 + $0x50] sm:$0xff] }
  0x97   :  { %1888 = vmatpush.bf16.msra.mxu0 %v2983_v56  ;;  %v3029_v56 = vld [vmem:[#allocation2 + $0x588] sm:$0xff] }
  0x98   :  { %1901 = vmatpush.bf16.msra.mxu1 %v2991_v57  ;;  %v3037_v57 = vld [vmem:[#allocation2 + $0x5c8] sm:$0xff] }
  0x99   :  { %1914 = vmatpush.bf16.msra.mxu2 %v2999_v58  ;;  %v51_v58 = vld [vmem:[%s3285_s0 + $0x58] sm:$0xff] }
  0x9a   :  { %1927 = vmatpush.bf16.msra.mxu3 %v3007_v59 }
  0x9b   :  { %1889 = vmatpush.bf16.msra.mxu0 %v2982_v60 }
  0x9c   :  { %1902 = vmatpush.bf16.msra.mxu1 %v2990_v61  ;;  %v472_v61 = vunpack.c.l.b16 %v50_v55 }
  0x9d   :  { %1915 = vmatpush.bf16.msra.mxu2 %v2998_v62  ;;  %v473_v62 = vunpack.c.h.b16 %v50_v55  ;;  %v1992_v55 = vld [vmem:[%s3288_s3 + $0x18] sm:$0xff] }
  0x9e   :  { %1928 = vmatpush.bf16.msra.mxu3 %v3006_v63  ;;  %v3012_v63 = vld [vmem:[#allocation2 + $0x500] sm:$0xff]  ;;  %v496_v5 = vpack.c.b16 %v472_v61, %v472_v61 }
  0x9f   :  { %1890 = vmatpush.bf16.msra.mxu0 %v2981_v0  ;;  %v3020_v0 = vld [vmem:[#allocation2 + $0x540] sm:$0xff] }
  0xa0   :  { %1903 = vmatpush.bf16.msra.mxu1 %v2989_v1  ;;  %v474_v1 = vunpack.c.l.b16 %v51_v58 }
  0xa1   :  { %1916 = vmatpush.bf16.msra.mxu2 %v2997_v2  ;;  %v475_v2 = vunpack.c.h.b16 %v51_v58 }
  0xa2   :  { %1929 = vmatpush.bf16.msra.mxu3 %v3005_v3  ;;  %v3028_v3 = vld [vmem:[#allocation2 + $0x580] sm:$0xff] }
  0xa3   :  { %1891 = vmatpush.bf16.msra.mxu0 %v2980_v6  ;;  %v1685_v31 = vpop.f32.mrf.mxu0  ;;  %v497_v6 = vpack.c.b16 %v473_v62, %v473_v62  ;;  %v499_v8 = vpack.c.b16 %v475_v2, %v475_v2  ;;  %v2040_v2 = vld [vmem:[%s3289_s4 + $0x70] sm:$0xff] }
  0xa4   :  { %1904 = vmatpush.bf16.msra.mxu1 %v2988_v7  ;;  %v1686_v34 = vadd.f32 %v3048_v28, %v1685_v31  ;;  %v1698_v35 = vpop.f32.mrf.mxu1  ;;  %v498_v7 = vpack.c.b16 %v474_v1, %v474_v1  ;;  %v2041_v1 = vld [vmem:[%s3289_s4 + $0x78] sm:$0xff] }
  0xa5   :  { %1917 = vmatpush.bf16.msra.mxu2 %v2996_v10 }
  0xa6   :  { %1930 = vmatpush.bf16.msra.mxu3 %v3004_v11  ;;  %1892 = vmatmul.bf16.vlgmr.msra.gmra.mxu0 %v492_v18  ;;  %v1699_v38 = vadd.f32 %v1698_v35, %v1686_v34 }
  0xa7   :  { %1936 = vmatpush.bf16.msrb.mxu0 %v3019_v14  ;;  %1905 = vmatmul.bf16.vlgmr.msra.gmra.mxu1 %v493_v20 }
  0xa8   :  { %1949 = vmatpush.bf16.msrb.mxu1 %v3027_v15  ;;  %1918 = vmatmul.bf16.vlgmr.msra.gmra.mxu2 %v494_v19 }
  0xa9   :  { %1962 = vmatpush.bf16.msrb.mxu2 %v3035_v16  ;;  %1931 = vmatmul.bf16.vlgmr.msra.gmra.mxu3 %v495_v21 }
  0xaa   :  { %1975 = vmatpush.bf16.msrb.mxu3 %v3043_v17 }
  0xab   :  { %1937 = vmatpush.bf16.msrb.mxu0 %v3018_v22  ;;  %v1711_v43 = vpop.f32.mrf.mxu2  ;;  %v1687_v46 = vpop.f32.mrf.mxu0 }
  0xac   :  { %1950 = vmatpush.bf16.msrb.mxu1 %v3026_v23  ;;  %v1712_v44 = vadd.f32 %v1711_v43, %v1699_v38  ;;  %v1724_v45 = vpop.f32.mrf.mxu3  ;;  %v1700_v50 = vpop.f32.mrf.mxu1  ;;  %v2003_v38 = vld [vmem:[%s3288_s3 + $0x70] sm:$0xff]  ;;  %v2000_v43 = vld [vmem:[%s3288_s3 + $0x58] sm:$0xff] }
  0xad   :  { %1963 = vmatpush.bf16.msrb.mxu2 %v3034_v24  ;;  %v1999_v46 = vld [vmem:[%s3288_s3 + $0x50] sm:$0xff] }
  0xae   :  { %1976 = vmatpush.bf16.msrb.mxu3 %v3042_v25  ;;  %v1725_v49 = vadd.f32 %v1724_v45, %v1712_v44  ;;  %v1995_v50 = vld [vmem:[%s3288_s3 + $0x30] sm:$0xff] }
  0xaf   :  { %1938 = vmatpush.bf16.msrb.mxu0 %v3017_v26 }
  0xb0   :  { %1951 = vmatpush.bf16.msrb.mxu1 %v3025_v27 }
  0xb1   :  { %1964 = vmatpush.bf16.msrb.mxu2 %v3033_v29 }
  0xb2   :  { %1977 = vmatpush.bf16.msrb.mxu3 %v3041_v30 }
  0xb3   :  { %1939 = vmatpush.bf16.msrb.mxu0 %v3016_v32  ;;  %v1713_v59 = vpop.f32.mrf.mxu2 }
  0xb4   :  { %1952 = vmatpush.bf16.msrb.mxu1 %v3024_v33  ;;  %v1726_v60 = vpop.f32.mrf.mxu3 }
  0xb5   :  { %1965 = vmatpush.bf16.msrb.mxu2 %v3032_v36  ;;  %v1990_v60 = vld [vmem:[%s3288_s3 + $0x8] sm:$0xff] }
  0xb6   :  { %1978 = vmatpush.bf16.msrb.mxu3 %v3040_v37  ;;  %v2004_v37 = vld [vmem:[%s3288_s3 + $0x78] sm:$0xff] }
  0xb7   :  { %1940 = vmatpush.bf16.msrb.mxu0 %v3015_v39 }
  0xb8   :  { %1953 = vmatpush.bf16.msrb.mxu1 %v3023_v40 }
  0xb9   :  { %1966 = vmatpush.bf16.msrb.mxu2 %v3031_v41  ;;  %v2002_v41 = vld [vmem:[%s3288_s3 + $0x68] sm:$0xff] }
  0xba   :  { %1979 = vmatpush.bf16.msrb.mxu3 %v3039_v42  ;;  %v2001_v42 = vld [vmem:[%s3288_s3 + $0x60] sm:$0xff] }
  0xbb   :  { %1941 = vmatpush.bf16.msrb.mxu0 %v3014_v47  ;;  %v1998_v47 = vld [vmem:[%s3288_s3 + $0x48] sm:$0xff] }
  0xbc   :  { %1954 = vmatpush.bf16.msrb.mxu1 %v3022_v48  ;;  %v1997_v48 = vld [vmem:[%s3288_s3 + $0x40] sm:$0xff] }
  0xbd   :  { %1967 = vmatpush.bf16.msrb.mxu2 %v3030_v51  ;;  %v1994_v51 = vld [vmem:[%s3288_s3 + $0x28] sm:$0xff] }
  0xbe   :  { %1980 = vmatpush.bf16.msrb.mxu3 %v3038_v52 }
  0xbf   :  { %1942 = vmatpush.bf16.msrb.mxu0 %v3013_v53  ;;  %v1993_v53 = vld [vmem:[%s3288_s3 + $0x20] sm:$0xff] }
  0xc0   :  { %1955 = vmatpush.bf16.msrb.mxu1 %v3021_v54 }
  0xc1   :  { %1968 = vmatpush.bf16.msrb.mxu2 %v3029_v56  ;;  %v1991_v56 = vld [vmem:[%s3288_s3 + $0x10] sm:$0xff] }
  0xc2   :  { %1981 = vmatpush.bf16.msrb.mxu3 %v3037_v57 }
  0xc3   :  { %1943 = vmatpush.bf16.msrb.mxu0 %v3012_v63  ;;  %v1737_v9 = vpop.f32.mrf.mxu0  ;;  %v1989_v63 = vld [vmem:[%s3288_s3] sm:$0xff] }
  0xc4   :  { %1956 = vmatpush.bf16.msrb.mxu1 %v3020_v0  ;;  %v1738_v10 = vadd.f32 %v1737_v9, %v1725_v49  ;;  %v1750_v11 = vpop.f32.mrf.mxu1  ;;  %v1996_v49 = vld [vmem:[%s3288_s3 + $0x38] sm:$0xff]  ;;  %s3105_s3 = smov [#allocation5]  }
  0xc5   :  { %1969 = vmatpush.bf16.msrb.mxu2 %v3028_v3  ;;  %v2037_v9 = vld [vmem:[%s3289_s4 + $0x58] sm:$0xff]  ;;  %s2072_s13 = sshll.u32 %s3105_s3, 4  ;;  %s2073_s13 = int_to_ptr.vmem [resolvable:$true] %s2072_s13 }
  0xc6   :  { %1982 = vmatpush.bf16.msrb.mxu3 %v3036_v4  ;;  %1944 = vmatmul.bf16.vlgmr.msrb.gmra.mxu0 %v496_v5  ;;  %v1751_v12 = vadd.f32 %v1750_v11, %v1738_v10  ;;  %v2039_v5 = vld [vmem:[%s3289_s4 + $0x68] sm:$0xff]  ;;  %v2036_v11 = vld [vmem:[%s3289_s4 + $0x50] sm:$0xff] }
  0xc7   :  { %1957 = vmatmul.bf16.vlgmr.msrb.gmra.mxu1 %v497_v6  ;;  %2005 = vmatpush.msra.mxu0 %v2004_v37  ;;  %v2026_v37 = vld [vmem:[%s3289_s4] sm:$0xff] }
  0xc8   :  { %1970 = vmatmul.bf16.vlgmr.msrb.gmra.mxu2 %v498_v7  ;;  %2046 = vmatpush.msra.mxu1 %v2041_v1  ;;  %v2038_v7 = vld [vmem:[%s3289_s4 + $0x60] sm:$0xff] }
  0xc9   :  { %1983 = vmatmul.bf16.vlgmr.msrb.gmra.mxu3 %v499_v8  ;;  %2006 = vmatpush.msra.mxu0 %v2003_v38 }
  0xca   :  { %2047 = vmatpush.msra.mxu1 %v2040_v2 }
  0xcb   :  { %v1763_v13 = vpop.f32.mrf.mxu2  ;;  %v1739_v16 = vpop.f32.mrf.mxu0  ;;  %2007 = vmatpush.msra.mxu0 %v2002_v41 }
  0xcc   :  { %v1764_v14 = vadd.f32 %v1763_v13, %v1751_v12  ;;  %v1776_v15 = vpop.f32.mrf.mxu3  ;;  %v1752_v18 = vpop.f32.mrf.mxu1  ;;  %2048 = vmatpush.msra.mxu1 %v2039_v5  ;;  %v2035_v12 = vld [vmem:[%s3289_s4 + $0x48] sm:$0xff]  ;;  %v2033_v16 = vld [vmem:[%s3289_s4 + $0x38] sm:$0xff] }
  0xcd   :  { %2008 = vmatpush.msra.mxu0 %v2001_v42 }
  0xce   :  { %v1777_v17 = vadd.f32 %v1776_v15, %v1764_v14  ;;  %2049 = vmatpush.msra.mxu1 %v2038_v7  ;;  %v2034_v14 = vld [vmem:[%s3289_s4 + $0x40] sm:$0xff] }
  0xcf   :  { %2009 = vmatpush.msra.mxu0 %v2000_v43 }
  0xd0   :  { %2050 = vmatpush.msra.mxu1 %v2037_v9 }
  0xd1   :  { %2010 = vmatpush.msra.mxu0 %v1999_v46 }
  0xd2   :  { %2051 = vmatpush.msra.mxu1 %v2036_v11 }
  0xd3   :  { %v1765_v19 = vpop.f32.mrf.mxu2  ;;  %2011 = vmatpush.msra.mxu0 %v1998_v47 }
  0xd4   :  { %v1778_v20 = vpop.f32.mrf.mxu3  ;;  %2052 = vmatpush.msra.mxu1 %v2035_v12 }
  0xd5   :  { %2012 = vmatpush.msra.mxu0 %v1997_v48 }
  0xd6   :  { %2053 = vmatpush.msra.mxu1 %v2034_v14 }
  0xd7   :  { %2013 = vmatpush.msra.mxu0 %v1996_v49 }
  0xd8   :  { %2054 = vmatpush.msra.mxu1 %v2033_v16 }
  0xd9   :  { %2014 = vmatpush.msra.mxu0 %v1995_v50 }
  0xdb   :  { %2015 = vmatpush.msra.mxu0 %v1994_v51 }
  0xdd   :  { %2016 = vmatpush.msra.mxu0 %v1993_v53 }
  0xdf   :  { %2017 = vmatpush.msra.mxu0 %v1992_v55 }
  0xe1   :  { %2018 = vmatpush.msra.mxu0 %v1991_v56 }
  0xe3   :  { %v1789_v21 = vpop.f32.mrf.mxu0  ;;  %2019 = vmatpush.msra.mxu0 %v1990_v60 }
  0xe4   :  { %v1790_v22 = vadd.f32 %v1789_v21, %v1777_v17  ;;  %v1802_v23 = vpop.f32.mrf.mxu1  ;;  %v2032_v17 = vld [vmem:[%s3289_s4 + $0x30] sm:$0xff]  ;;  %v2031_v21 = vld [vmem:[%s3289_s4 + $0x28] sm:$0xff] }
  0xe5   :  { %2020 = vmatpush.msra.mxu0 %v1989_v63  ;;  %2055 = vmatpush.msra.mxu1 %v2032_v17 }
  0xe6   :  { %v1803_v24 = vadd.f32 %v1802_v23, %v1790_v22  ;;  %v2030_v23 = vld [vmem:[%s3289_s4 + $0x20] sm:$0xff] }
  0xe7   :  { %2056 = vmatpush.msra.mxu1 %v2031_v21 }
  0xe9   :  { %2057 = vmatpush.msra.mxu1 %v2030_v23 }
  0xeb   :  { %v1815_v25 = vpop.f32.mrf.mxu2  ;;  %v1791_v28 = vpop.f32.mrf.mxu0 }
  0xec   :  { %v1816_v26 = vadd.f32 %v1815_v25, %v1803_v24  ;;  %v1828_v27 = vpop.f32.mrf.mxu3  ;;  %v1804_v30 = vpop.f32.mrf.mxu1  ;;  %v2029_v24 = vld [vmem:[%s3289_s4 + $0x18] sm:$0xff]  ;;  %v2028_v28 = vld [vmem:[%s3289_s4 + $0x10] sm:$0xff] }
  0xed   :  { %2058 = vmatpush.msra.mxu1 %v2029_v24 }
  0xee   :  { %v1829_v29 = vadd.f32 %v1828_v27, %v1816_v26 }
  0xef   :  { %2059 = vmatpush.msra.mxu1 %v2028_v28 }
  0xf3   :  { %v1817_v31 = vpop.f32.mrf.mxu2 }
  0xf4   :  { %v1830_v32 = vpop.f32.mrf.mxu3 }
 0x103   :  { %v1841_v33 = vpop.f32.mrf.mxu0 }
 0x104   :  { %v1854_v34 = vpop.f32.mrf.mxu1  ;;  %v1842_v58 = vadd.f32 %v1841_v33, %v1829_v29 }
 0x106   :  { %v1855_v0 = vadd.f32 %v1854_v34, %v1842_v58 }
 0x10b   :  { %v1867_v35 = vpop.f32.mrf.mxu2  ;;  %v1843_v39 = vpop.f32.mrf.mxu0 }
 0x10c   :  { %v1880_v36 = vpop.f32.mrf.mxu3  ;;  %v1856_v40 = vpop.f32.mrf.mxu1  ;;  %v1868_v3 = vadd.f32 %v1867_v35, %v1855_v0 }
 0x10d   :  { %v3049_v40 = vld [vmem:[%s3290_s5] ss:$0 sm:$0xff] }
 0x10e   :  { %v1881_v8 = vadd.f32 %v1880_v36, %v1868_v3  ;;  %v2027_v36 = vld [vmem:[%s3289_s4 + $0x8] sm:$0xff] }
 0x10f   :  { %2060 = vmatpush.msra.mxu1 %v2027_v36 }
 0x111   :  { %2061 = vmatpush.msra.mxu1 %v2026_v37 }
 0x113   :  { %v1869_v44 = vpop.f32.mrf.mxu2 }
 0x114   :  { %v1882_v45 = vpop.f32.mrf.mxu3 }
 0x123   :  { %v1893_v52 = vpop.f32.mrf.mxu0 }
 0x124   :  { %v1906_v54 = vpop.f32.mrf.mxu1  ;;  %v1894_v10 = vadd.f32 %v1893_v52, %v1881_v8 }
 0x126   :  { %v1907_v13 = vadd.f32 %v1906_v54, %v1894_v10 }
 0x12b   :  { %v1919_v57 = vpop.f32.mrf.mxu2  ;;  %v1895_v61 = vpop.f32.mrf.mxu0 }
 0x12c   :  { %v1932_v59 = vpop.f32.mrf.mxu3  ;;  %v1908_v62 = vpop.f32.mrf.mxu1  ;;  %v1920_v15 = vadd.f32 %v1919_v57, %v1907_v13 }
 0x12e   :  { %v1933_v18 = vadd.f32 %v1932_v59, %v1920_v15 }
 0x133   :  { %v1921_v4 = vpop.f32.mrf.mxu2 }
 0x134   :  { %v1934_v6 = vpop.f32.mrf.mxu3 }
 0x143   :  { %v1945_v19 = vpop.f32.mrf.mxu0 }
 0x144   :  { %v1958_v20 = vpop.f32.mrf.mxu1  ;;  %v1946_v22 = vadd.f32 %v1945_v19, %v1933_v18 }
 0x146   :  { %v1959_v25 = vadd.f32 %v1958_v20, %v1946_v22 }
 0x14b   :  { %v1971_v26 = vpop.f32.mrf.mxu2  ;;  %v1947_v30 = vpop.f32.mrf.mxu0 }
 0x14c   :  { %v1984_v27 = vpop.f32.mrf.mxu3  ;;  %v1972_v29 = vadd.f32 %v1971_v26, %v1959_v25  ;;  %v1960_v31 = vpop.f32.mrf.mxu1 }
 0x14e   :  { %v1985_v32 = vadd.f32 %v1984_v27, %v1972_v29 }
 0x150   :  { %v1988_v33 = vmax.f32 %v1985_v32, 0.0 }
 0x152   :  { %2021 = vmatmul.f32.vlgmr.msra.gmra.mxu0 %v1988_v33 }
 0x153   :  { %v1973_v34 = vpop.f32.mrf.mxu2 }
 0x154   :  { %v1986_v35 = vpop.f32.mrf.mxu3 }
 0x1cf   :  { %v2022_v38 = vpop.f32.mrf.mxu0 }
 0x1d0   :  { %v2025_v39 = vmax.f32 %v2022_v38, 0.0 }
 0x1d2   :  { %2062 = vmatmul.f32.vlgmr.msra.gmra.mxu1 %v2025_v39 }
 0x24f   :  { %v2063_v41 = vpop.f32.mrf.mxu1 }
 0x250   :  { %v2064_v42 = vadd.f32 %v3049_v40, %v2063_v41 }
 0x252   :  { %2066 = vst [vmem:[#allocation5] sm:$0xff] %v2064_v42 }
 0x253   :  { %2077 = dma.vmem_to_hbm [thread:$0]  %s2073_s13, 128, %s2075_s16, [#allocation4]  }
 0x254   :  { %3100 = dma.done.wait [#allocation4], 128  }
 0x255   :  { %3101 = vsyncadd [#allocation4], 4294967168 }
 0x256   :  { %2082 = vsyncpa [#allocation3], 1 }
 0x257   :  { %2083 = vsyncpa [#allocation4], 1 }

</bundles_post_ra>
